<compile_context>
chip_gen: v5e
topology: v5e:2x2
jax: 0.10.0
libtpu: 0.0.40
codegen_flags: <defaults>
</compile_context>

<pallas_src>
import functools

import jax
import jax.numpy as jnp
from jax.experimental import pallas as pl
from jax.experimental.pallas import tpu as pltpu


def _expand_kernel(x_ref, o_ref):
    """x_ref: (b_blk, 2*c_blk, l_blk) -> o_ref: (b_blk, c_blk, 2*l_blk)."""
    bb, c2b, lb = x_ref.shape
    cb = c2b // 2
    x = x_ref[...]
    # (bb, cb, 2, lb) -> (bb, cb, lb, 2) -> (bb, cb, 2*lb): even input channel
    # lands on even output lanes, odd input channel on odd output lanes.
    xt = jnp.transpose(x.reshape(bb, cb, 2, lb), (0, 1, 3, 2))
    o_ref[...] = xt.reshape(bb, cb, 2 * lb)


def _cdiv(a, d):
    return -(-a // d)


@functools.lru_cache(maxsize=None)
def _tpu_params():
    """(vmem_capacity_bytes, tensorcores_per_chip) with safe fallbacks."""
    vmem_bytes = 64 << 20      # conservative default (v7x per-TC VMEM)
    num_cores = 1              # v5e/v6e: single TensorCore per chip
    try:
        info = pltpu.get_tpu_info()
        vmem_bytes = int(getattr(info, "vmem_capacity_bytes", vmem_bytes))
    except Exception:
        pass
    try:
        kind = jax.devices()[0].device_kind.lower()
        if "v7" in kind:       # v7x: 2 TensorCores share the "parallel" grid
            num_cores = 2
    except Exception:
        pass
    return vmem_bytes, num_cores


def _sublane_align(itemsize):
    """Sublane (second-minor) packing granularity per dtype width."""
    # f32/i32 -> 8, bf16/f16 -> 16, int8/fp8 -> 32.
    return max(8, 32 // max(int(itemsize), 1))


def _pick_tiles(b, c, l, itemsize, target_bytes, num_cores):
    """Choose (b_blk, c_blk, l_blk); each VMEM block is ~target_bytes."""
    c_align = _sublane_align(itemsize)
    max_elems = max(target_bytes // itemsize, 2 * c_align * 128)

    # 1) Length tile: prefer the full row -- fully contiguous HBM DMAs and a
    #    lane-dense output with no masked vst on L edge blocks.  Only tile L
    #    when even a minimal (c_align channel pairs x L) slab blows the
    #    budget; a tiled l_blk is a multiple of 128 so the input (l_blk lanes)
    #    and output (2*l_blk lanes) blocks both stay lane-aligned.
    if l <= 128 or 2 * c_align * l <= max_elems:
        l_blk = l
    else:
        l_blk = max(128, (max_elems // (2 * c_align)) // 128 * 128)

    # 2) Channel tile: full C if a (2C, l_blk) slab fits; otherwise a multiple
    #    of the dtype's sublane packing so both the input (2*c_blk) and output
    #    (c_blk) second-minor dims stay aligned for narrow dtypes too.
    if c <= c_align or 2 * c * l_blk <= max_elems:
        c_blk = c
    else:
        c_blk = (max_elems // (2 * l_blk)) // c_align * c_align
        c_blk = int(min(max(c_blk, c_align), c))

    # 3) Batch tile: pack several batches per grid step when slabs are tiny so
    #    the fixed per-step overhead is amortized.
    per_batch = 2 * c_blk * l_blk
    b_blk = int(max(1, min(b, max_elems // max(per_batch, 1))))

    # 4) Megacore balance (multi-TC chips only): keep the total "parallel"
    #    step count a multiple of the TensorCore count so neither core idles
    #    on the tail.  Single-TC v5e/v6e skip this -- an extra grid step there
    #    is pure per-step + DMA overhead with no parallelism gained.
    if num_cores > 1:
        nc = _cdiv(c, c_blk)
        nl = _cdiv(l, l_blk)
        if (_cdiv(b, b_blk) * nc * nl) % num_cores != 0 and b > 1:
            nb_target = _cdiv(_cdiv(b, b_blk), num_cores) * num_cores
            b_new = max(1, _cdiv(b, nb_target))
            if (_cdiv(b, b_new) * nc * nl) % num_cores == 0:
                b_blk = b_new
        if (_cdiv(b, b_blk) * nc * nl) % num_cores != 0 and c_blk > c_align:
            c_new = max(c_align, _cdiv(_cdiv(c, num_cores), c_align) * c_align)
            if (_cdiv(b, b_blk) * _cdiv(c, c_new) * nl) % num_cores == 0:
                c_blk = c_new

    return b_blk, c_blk, l_blk


@functools.partial(jax.jit, static_argnums=(1, 2))
def just_expand(x, out_channels, block_bytes=None):
    """Pallas implementation of JustExpand.forward.

    x: (B, 2*out_channels, L) -> (B, out_channels, 2*L)

    block_bytes (static, optional) overrides the per-block VMEM budget; used
    by the tests to force a multi-block grid on small inputs.
    """
    b, c2, l = x.shape
    assert c2 == 2 * out_channels, "input channel dim must equal 2*out_channels"
    itemsize = jnp.dtype(x.dtype).itemsize

    vmem_bytes, num_cores = _tpu_params()
    # Pure HBM-bandwidth relayout: the biggest blocks that comfortably fit.
    # ~4 MiB/block on 128 MiB-VMEM chips (v5e/v6e), ~2 MiB on v7x (64 MiB/TC).
    if block_bytes is None:
        block_bytes = max(1 << 20, min(4 << 20, vmem_bytes // 32))

    b_blk, c_blk, l_blk = _pick_tiles(b, out_channels, l, itemsize,
                                      block_bytes, num_cores)
    grid = (_cdiv(b, b_blk), _cdiv(out_channels, c_blk), _cdiv(l, l_blk))

    in_block_bytes = b_blk * 2 * c_blk * l_blk * itemsize
    out_block_bytes = b_blk * c_blk * 2 * l_blk * itemsize
    # Double-buffered in + out blocks plus headroom for relayout temporaries,
    # with a generation-aware cap (slack on 128 MiB chips, tighter on v7x).
    vmem_cap = (96 << 20) if vmem_bytes >= (96 << 20) else (48 << 20)
    vmem_limit = int(min(vmem_cap,
                         4 * (in_block_bytes + out_block_bytes) + (8 << 20)))

    return pl.pallas_call(
        _expand_kernel,
        out_shape=jax.ShapeDtypeStruct((b, out_channels, 2 * l), x.dtype),
        grid_spec=pltpu.PrefetchScalarGridSpec(
            num_scalar_prefetch=0,
            grid=grid,
            in_specs=[
                pl.BlockSpec((b_blk, 2 * c_blk, l_blk),
                             lambda bi, ci, li: (bi, ci, li)),
            ],
            out_specs=pl.BlockSpec((b_blk, c_blk, 2 * l_blk),
                                   lambda bi, ci, li: (bi, ci, li)),
        ),
        compiler_params=pltpu.CompilerParams(
            dimension_semantics=("parallel", "parallel", "parallel"),
            vmem_limit_bytes=vmem_limit,
        ),
        # Bandwidth-only op: one full HBM read + one full HBM write of x.
        cost_estimate=pl.CostEstimate(
            flops=0, transcendentals=0,
            bytes_accessed=2 * b * c2 * l * itemsize),
    )(x)


def just_expand_ref(x, out_channels):
    """Pure-JAX reference mirroring the PyTorch module exactly."""
    b, _, l = x.shape
    xt = jnp.transpose(x.reshape(b, out_channels, 2, l), (0, 1, 3, 2))
    return xt.reshape(b, out_channels, 2 * l)


if __name__ == "__main__":
    # JustExpand has no learnable parameters; only out_channels is configured.
    key = jax.random.PRNGKey(0)

    # Small shape implied by the module: B=2, out_channels=4, L=16, f32.
    out_channels = 4
    B, L = 2, 16
    x = jax.random.normal(key, (B, 2 * out_channels, L), dtype=jnp.float32)
    out = jax.block_until_ready(just_expand(x, out_channels))
    ref = just_expand_ref(x, out_channels)
    assert out.shape == (B, out_channels, 2 * L)
    assert out.dtype == x.dtype
    assert jnp.array_equal(out, ref), "Pallas output does not match reference"

    # Tiled path with non-divisible channel/length edges: a tiny block budget
    # forces a multi-block grid so edge-block masking is exercised too.
    oc2, B2, L2 = 20, 3, 400
    x2 = jax.random.normal(jax.random.PRNGKey(1), (B2, 2 * oc2, L2),
                           dtype=jnp.float32)
    out2 = jax.block_until_ready(just_expand(x2, oc2, 16 * 1024))
    assert out2.shape == (B2, oc2, 2 * L2)
    assert jnp.array_equal(out2, just_expand_ref(x2, oc2)), \
        "tiled Pallas output does not match reference"

    print("KERNEL_OK")
</pallas_src>

<mosaic_0001>
module attributes {stable_mosaic.version = 11 : i64} {
  func.func @_expand_kernel(%arg0: i32, %arg1: i32, %arg2: i32, %arg3: memref<2x8x16xf32, #tpu.memory_space<vmem>>, %arg4: memref<2x4x32xf32, #tpu.memory_space<vmem>>) attributes {dimension_semantics = [#tpu.dimension_semantics<parallel>, #tpu.dimension_semantics<parallel>, #tpu.dimension_semantics<parallel>], iteration_bounds = array<i64: 1, 1, 1>, scalar_prefetch = 0 : i64, scratch_operands = 0 : i64, tpu.core_type = #tpu.core_type<tc>, window_params = [{transform_indices = @transform_0, window_bounds = array<i64: 2, 8, 16>}, {transform_indices = @transform_1, window_bounds = array<i64: 2, 4, 32>}]} {
    %c0 = arith.constant 0 : index
    %c0_0 = arith.constant 0 : index
    %c0_1 = arith.constant 0 : index
    %0 = vector.load %arg3[%c0, %c0_0, %c0_1] : memref<2x8x16xf32, #tpu.memory_space<vmem>>, vector<2x8x16xf32>
    %1 = vector.shape_cast %0 : vector<2x8x16xf32> to vector<2x4x2x16xf32>
    %2 = tpu.transpose %1, [0, 1, 3, 2] : vector<2x4x2x16xf32> -> vector<2x4x16x2xf32>
    %3 = vector.shape_cast %2 : vector<2x4x16x2xf32> to vector<2x4x32xf32>
    %c0_2 = arith.constant 0 : index
    %c0_3 = arith.constant 0 : index
    %c0_4 = arith.constant 0 : index
    %4 = vector.load %arg4[%c0_2, %c0_3, %c0_4] : memref<2x4x32xf32, #tpu.memory_space<vmem>>, vector<2x4x32xf32>
    tpu.vector_store %arg4[%c0_2, %c0_3, %c0_4], %3 {strides = array<i32>} : memref<2x4x32xf32, #tpu.memory_space<vmem>>, vector<2x4x32xf32>,
    return
  }
  func.func @transform_0(%arg0: i32, %arg1: i32, %arg2: i32) -> (i32, i32, i32) {
    %c0_i32 = arith.constant 0 : i32
    return %arg0, %arg1, %arg2 : i32, i32, i32
  }
  func.func @transform_1(%arg0: i32, %arg1: i32, %arg2: i32) -> (i32, i32, i32) {
    %c0_i32 = arith.constant 0 : i32
    return %arg0, %arg1, %arg2 : i32, i32, i32
  }
}

</mosaic_0001>

<bundles_post_ra>
// kernel: just_expand.1
= control target key start
LH: loop header
LB: loop body
LE: loop exit
PB: predicated region body
PF: predicated region fallthrough
CT: control target
= control target key end

     0   :  { %6 = vsyncpa [#allocation3], 0  ;;  %s1006_s0 = inlined_call_operand.hbm [shape: f32[2,8,16], index: 0, kind: input, shape index: {}]   ;;  %s1007_s1 = inlined_call_operand.hbm [shape: f32[2,4,32], index: 1, kind: output, shape index: {}]  }
   0x1   :  { %7 = vsyncpa [#allocation4], 0  ;;  %s12_s8 = sshll.u32 %s1006_s0, 4  ;;  %s783_s9 = smov [#allocation2]   ;;  %s13_s8 = int_to_ptr.hbm [resolvable:$true] %s12_s8 }
   0x2   :  { %s14_s10 = sshll.u32 %s783_s9, 4  ;;  %s784_s11 = smov 128   ;;  %s15_s10 = int_to_ptr.vmem [resolvable:$true] %s14_s10 }
   0x3   :  { %s785_s12 = smov 8  }
   0x4   :  { %20 = dma.hbm_to_vmem [thread:$0]  %s13_s8, 256, %s15_s10, [#allocation3], %s784_s11, %s784_s11, %s785_s12  }
   0x5   :  { %779 = dma.done.wait [#allocation3], 256  }
   0x6   :  { %780 = vsyncadd [#allocation3], 4294967040  ;;  %v25_v0 = vld [vmem:[#allocation2] sm:$0xff]  ;;  %v26_v1 = vld [vmem:[#allocation2 + $0x8] sm:$0xff]  ;;  %v786_v10 = vmov 1983009808  }
   0x7   :  { %41 = vxpose.xlu0.b32.start.end [1/1] (short) (narrow) %v25_v0, 16  ;;  %v30_v2 = vrot.slane %v25_v0, 4  ;;  %169 = vxpose.xlu2.b32.start.end [1/1] (short) (narrow) %v26_v1, 16  ;;  %v29_v3 = vrot.slane %v25_v0, 2  ;;  %v32_v4 = vrot.slane %v26_v1, 2  ;;  %v31_v5 = vrot.slane %v25_v0, 6 }
   0x8   :  { %v33_v6 = vrot.slane %v26_v1, 4  ;;  %v34_v7 = vrot.slane %v26_v1, 6  ;;  %v303_v11 = vunpack.c.l.s4 %v786_v10  ;;  %vm298_vm0 = vcmask 1047556   ;;  %s788_s0 = smov 4   ;;  %s789_s13 = smov 2  }
   0x9   :  { %105 = vxpose.xlu1.b32.start.end [1/1] (short) (narrow) %v30_v2, 16  ;;  %v787_v26 = vmov 1934713408   ;;  %s790_s14 = smov 6   ;;  %s791_s15 = smov 10   ;;  %vm642_vm1 = vcmask 15360  }
   0xa   :  { %v823_v15 = vunpack.c.0.s8 %v303_v11  ;;  %v327_v27 = vunpack.c.l.s4 %v787_v26  ;;  %s792_s16 = smov 12   ;;  %s793_s17 = smov 14   ;;  %vm645_vm2 = vcmask 31744   ;;  %vm648_vm3 = vcmask 48128  }
   0xb   :  { %s794_s18 = smov 16   ;;  %s795_s19 = smov 18   ;;  %vm651_vm4 = vcmask 64512   ;;  %vm654_vm5 = vcmask 80896   ;;  %vm657_vm6 = vcmask 97280   ;;  %vm663_vm7 = vcmask 130048  }
   0xc   :  { %v836_v32 = vunpack.c.0.s8 %v327_v27  ;;  %s796_s20 = smov 20   ;;  %s797_s21 = smov 22   ;;  %vm660_vm8 = vcmask 113664   ;;  %vm666_vm9 = vcmask 146432   ;;  %vm672_vm10 = vcmask 179200  }
   0xd   :  { %s798_s22 = smov 24   ;;  %s799_s23 = smov 26   ;;  %vm669_vm11 = vcmask 162816   ;;  %vm675_vm12 = vcmask 195584   ;;  %vm681_vm13 = vcmask 228352   ;;  %vm678_vm14 = vcmask 211968  }
   0xe   :  { %s800_s24 = smov 28   ;;  %s801_s25 = smov 30   ;;  %vm684_vm15 = vcmask 244736  }
   0xf   :  { %s696_s28 = sshll.u32 %s1007_s1, 4  ;;  %s802_s29 = smov [#allocation5]   ;;  %s697_s28 = int_to_ptr.hbm [resolvable:$true] %s696_s28 }
  0x10   :  { %s694_s30 = sshll.u32 %s802_s29, 4  ;;  %s803_s2 = smov 64   ;;  %s695_s30 = int_to_ptr.vmem [resolvable:$true] %s694_s30 }
  0x17   :  { %73 = vxpose.xlu0.b32.start.end [1/1] (short) (narrow) %v29_v3, 16  ;;  %201 = vxpose.xlu2.b32.start.end [1/1] (short) (narrow) %v32_v4, 16 }
  0x19   :  { %137 = vxpose.xlu1.b32.start.end [1/1] (short) (narrow) %v31_v5, 16 }
  0x27   :  { %233 = vxpose.xlu0.b32.start.end [1/1] (short) (narrow) %v33_v6, 16 }
  0x29   :  { %265 = vxpose.xlu1.b32.start.end [1/1] (short) (narrow) %v34_v7, 16 }
  0xa0   :  { %v818_v12 = vpop.trf.xlu2 }
  0xa1   :  { %v412_v7 = vrot.slane %v818_v12, 4 }
  0xa8   :  { %v831_v22 = vpop.trf.xlu2 }
  0xab   :  { %v57_v8 = vpop.trf.xlu0 }
  0xac   :  { %v300_v46 = vrot.slane %v57_v8, 4 }
  0xad   :  { %v121_v9 = vpop.trf.xlu1 }
  0xae   :  { %v297_v17 = vrot.slane %v121_v9, 4  ;;  %v301_v57 = vsel %vm298_vm0, %v121_v9, %v300_v46 }
  0xaf   :  { %v309_v3 = vperm.slane %v301_v57, %v823_v15 }
  0xb0   :  { %v299_v20 = vsel %vm298_vm0, %v297_v17, %v57_v8  ;;  %v217_v39 = vpop.trf.xlu2 }
  0xb1   :  { %v305_v23 = vperm.slane %v299_v20, %v823_v15  ;;  %v424_v52 = vrot.slane %v217_v39, 4 }
  0xb3   :  { %v820_v13 = vpop.trf.xlu0  ;;  %v324_v29 = vrot.slane %v305_v23, 4 }
  0xb4   :  { %v356_v14 = vrot.slane %v820_v13, 4 }
  0xb5   :  { %v825_v16 = vpop.trf.xlu1 }
  0xb6   :  { %v357_v18 = vsel %vm298_vm0, %v825_v16, %v356_v14 }
  0xb7   :  { %v365_v19 = vperm.slane %v357_v18, %v823_v15  ;;  %v468_v18 = vrot.slane %v831_v22, 4 }
  0xb8   :  { %v218_v6 = vpop.trf.xlu2 }
  0xb9   :  { %v392_v44 = vrot.slane %v365_v19, 4  ;;  %v480_v20 = vrot.slane %v218_v6, 4 }
  0xbb   :  { %v89_v21 = vpop.trf.xlu0 }
  0xbc   :  { %v312_v31 = vrot.slane %v89_v21, 4 }
  0xbd   :  { %v153_v24 = vpop.trf.xlu1 }
  0xbe   :  { %v310_v25 = vrot.slane %v153_v24, 4  ;;  %v313_v41 = vsel %vm298_vm0, %v153_v24, %v312_v31 }
  0xbf   :  { %v856_v48 = vperm.slane %v313_v41, %v823_v15 }
  0xc0   :  { %v311_v28 = vsel %vm298_vm0, %v310_v25, %v89_v21 }
  0xc1   :  { %v317_v30 = vperm.slane %v311_v28, %v823_v15  ;;  %v334_v60 = vrot.slane %v856_v48, 4 }
  0xc3   :  { %v322_v33 = vrot.slane %v317_v30, 4  ;;  %v838_v34 = vpop.trf.xlu0  ;;  %v325_v35 = vsel %vm298_vm0, %v317_v30, %v324_v29  ;;  %v335_v17 = vsel %vm298_vm0, %v334_v60, %v309_v3 }
  0xc4   :  { %v368_v36 = vrot.slane %v838_v34, 4  ;;  %v333_v37 = vperm.slane %v325_v35, %v836_v32  ;;  %v341_v27 = vperm.slane %v335_v17, %v836_v32 }
  0xc5   :  { %v843_v38 = vpop.trf.xlu1  ;;  %v323_v40 = vsel %vm298_vm0, %v322_v33, %v305_v23 }
  0xc6   :  { %v369_v42 = vsel %vm298_vm0, %v843_v38, %v368_v36  ;;  %532 = vrot.lane.b32.xlu1 %v333_v37, %s788_s0  ;;  %v851_v43 = vperm.slane %v323_v40, %v836_v32  ;;  %v348_v50 = vrot.slane %v333_v37, 4  ;;  %v366_v46 = vrot.slane %v843_v38, 4 }
  0xc7   :  { %v377_v45 = vperm.slane %v369_v42, %v823_v15 }
  0xc8   :  { %v346_v47 = vrot.slane %v851_v43, 4  ;;  %v349_v62 = vsel %vm298_vm0, 0.0, %v348_v50 }
  0xc9   :  { %v390_v49 = vrot.slane %v377_v45, 4  ;;  %v393_v51 = vsel %vm298_vm0, %v377_v45, %v392_v44  ;;  %v350_v44 = vrot.slane %v341_v27, 4 }
  0xca   :  { %v347_v53 = vsel %vm298_vm0, 0.0, %v346_v47  ;;  %v861_v54 = vperm.slane %v393_v51, %v836_v32 }
  0xcb   :  { %524 = vrot.lane.b32.xlu2 %v347_v53, %s789_s13  ;;  %v249_v55 = vpop.trf.xlu0  ;;  %v391_v56 = vsel %vm298_vm0, %v390_v49, %v365_v19  ;;  %v351_v38 = vsel %vm298_vm0, 0.0, %v350_v44 }
  0xcc   :  { %v410_v58 = vrot.slane %v249_v55, 4  ;;  %v867_v59 = vperm.slane %v391_v56, %v836_v32  ;;  %v408_v63 = vrot.slane %v861_v54, 4  ;;  %v413_v19 = vsel %vm298_vm0, %v249_v55, %v412_v7 }
  0xcd   :  { %v281_v61 = vpop.trf.xlu1  ;;  %v421_v29 = vperm.slane %v413_v19, %v823_v15  ;;  %v336_v55 = vrot.slane %v309_v3, 4  ;;  %v354_v3 = vrot.slane %v825_v16, 4 }
  0xce   :  { %v411_v0 = vsel %vm298_vm0, %v410_v58, %v818_v12  ;;  %v422_v1 = vrot.slane %v281_v61, 4  ;;  %v425_v2 = vsel %vm298_vm0, %v281_v61, %v424_v52  ;;  %540 = vrot.lane.b32.xlu1 %v349_v62, %s790_s14  ;;  %v406_v9 = vrot.slane %v867_v59, 4 }
  0xcf   :  { %v417_v4 = vperm.slane %v411_v0, %v823_v15  ;;  %v879_v5 = vperm.slane %v425_v2, %v823_v15  ;;  %v885_v10 = vsel %vm298_vm0, 0.0, %v408_v63  ;;  %v448_v57 = vrot.slane %v421_v29, 4 }
  0xd0   :  { %v423_v8 = vsel %vm298_vm0, %v422_v1, %v217_v39  ;;  %v892_v21 = vsel %vm298_vm0, 0.0, %v406_v9  ;;  %v367_v61 = vsel %vm298_vm0, %v366_v46, %v838_v34  ;;  %v337_v1 = vsel %vm298_vm0, %v856_v48, %v336_v55 }
  0xd1   :  { %v436_v11 = vrot.slane %v417_v4, 4  ;;  %v429_v14 = vperm.slane %v423_v8, %v823_v15  ;;  %v446_v23 = vrot.slane %v879_v5, 4  ;;  %v373_v34 = vperm.slane %v367_v61, %v823_v15 }
  0xd2   :  { %v449_v8 = vsel %vm298_vm0, %v879_v5, %v448_v57  ;;  %v345_v48 = vperm.slane %v337_v1, %v836_v32 }
  0xd3   :  { %v434_v12 = vrot.slane %v429_v14, 4  ;;  %v250_v24 = vpop.trf.xlu0  ;;  %v437_v25 = vsel %vm298_vm0, %v429_v14, %v436_v11  ;;  %v447_v40 = vsel %vm298_vm0, %v446_v23, %v421_v29  ;;  %v355_v11 = vsel %vm298_vm0, %v354_v3, %v820_v13 }
  0xd4   :  { %v469_v26 = vsel %vm298_vm0, %v250_v24, %v468_v18  ;;  %v445_v28 = vperm.slane %v437_v25, %v836_v32  ;;  %v453_v49 = vperm.slane %v447_v40, %v836_v32  ;;  %v466_v7 = vrot.slane %v250_v24, 4 }
  0xd5   :  { %v477_v30 = vperm.slane %v469_v26, %v823_v15  ;;  %v282_v31 = vpop.trf.xlu1  ;;  %v435_v33 = vsel %vm298_vm0, %v434_v12, %v417_v4  ;;  %v457_v16 = vperm.slane %v449_v8, %v836_v32  ;;  %v378_v14 = vrot.slane %v373_v34, 4 }
  0xd6   :  { %v481_v35 = vsel %vm298_vm0, %v282_v31, %v480_v20  ;;  %548 = vrot.lane.b32.xlu1 %v341_v27, %s785_s12  ;;  %534 = vrot.lane.b32.xlu2 %v445_v28, %s788_s0  ;;  %v906_v36 = vperm.slane %v435_v33, %v836_v32  ;;  %v460_v45 = vrot.slane %v445_v28, 4  ;;  %v478_v51 = vrot.slane %v282_v31, 4 }
  0xd7   :  { %v504_v37 = vrot.slane %v477_v30, 4  ;;  %v489_v39 = vperm.slane %v481_v35, %v823_v15  ;;  %v462_v62 = vrot.slane %v453_v49, 4  ;;  %v467_v17 = vsel %vm298_vm0, %v466_v7, %v831_v22 }
  0xd8   :  { %v458_v41 = vrot.slane %v906_v36, 4  ;;  %v461_v58 = vsel %vm298_vm0, 0.0, %v460_v45  ;;  %v479_v0 = vsel %vm298_vm0, %v478_v51, %v218_v6  ;;  %v352_v5 = vrot.slane %v345_v48, 4 }
  0xd9   :  { %v502_v42 = vrot.slane %v489_v39, 4  ;;  %v505_v50 = vsel %vm298_vm0, %v489_v39, %v504_v37  ;;  %v485_v9 = vperm.slane %v479_v0, %v823_v15  ;;  %v463_v6 = vsel %vm298_vm0, 0.0, %v462_v62 }
  0xda   :  { %v459_v47 = vsel %vm298_vm0, 0.0, %v458_v41  ;;  %v918_v53 = vperm.slane %v505_v50, %v836_v32  ;;  %v361_v19 = vperm.slane %v355_v11, %v823_v15  ;;  %v473_v20 = vperm.slane %v467_v17, %v823_v15 }
  0xdb   :  { %526 = vrot.lane.b32.xlu0 %v459_v47, %s789_s13  ;;  %v503_v52 = vsel %vm298_vm0, %v502_v42, %v477_v30  ;;  %v490_v18 = vrot.slane %v485_v9, 4  ;;  %v353_v13 = vsel %vm298_vm0, 0.0, %v352_v5  ;;  %v464_v26 = vrot.slane %v457_v16, 4 }
  0xdc   :  { %v921_v56 = vperm.slane %v503_v52, %v836_v32  ;;  %v520_v60 = vrot.slane %v918_v53, 4  ;;  %v379_v12 = vsel %vm298_vm0, %v378_v14, %v361_v19  ;;  %v380_v25 = vrot.slane %v361_v19, 4 }
  0xdd   :  { %v491_v23 = vsel %vm298_vm0, %v490_v18, %v473_v20  ;;  %v385_v22 = vperm.slane %v379_v12, %v836_v32  ;;  %v492_v28 = vrot.slane %v473_v20, 4  ;;  %v465_v29 = vsel %vm298_vm0, 0.0, %v464_v26 }
  0xde   :  { %556 = vrot.lane.b32.xlu1 %v351_v38, %s791_s15  ;;  %542 = vrot.lane.b32.xlu2 %v461_v58, %s790_s14  ;;  %v518_v63 = vrot.slane %v921_v56, 4  ;;  %v934_v2 = vsel %vm298_vm0, 0.0, %v520_v60  ;;  %v497_v24 = vperm.slane %v491_v23, %v836_v32  ;;  %v381_v15 = vsel %vm298_vm0, %v373_v34, %v380_v25 }
  0xdf   :  { %v389_v31 = vperm.slane %v381_v15, %v836_v32  ;;  %v493_v33 = vsel %vm298_vm0, %v485_v9, %v492_v28  ;;  %v402_v35 = vrot.slane %v385_v22, 4 }
  0xe0   :  { %v938_v4 = vsel %vm298_vm0, 0.0, %v518_v63  ;;  %v514_v27 = vrot.slane %v497_v24, 4  ;;  %v501_v39 = vperm.slane %v493_v33, %v836_v32 }
  0xe1   :  { %v404_v37 = vrot.slane %v389_v31, 4  ;;  %v403_v40 = vsel %vm298_vm0, 0.0, %v402_v35 }
  0xe2   :  { %v515_v30 = vsel %vm298_vm0, 0.0, %v514_v27  ;;  %v516_v42 = vrot.slane %v501_v39, 4 }
  0xe3   :  { %558 = vrot.lane.b32.xlu0 %v463_v6, %s791_s15  ;;  %v405_v41 = vsel %vm298_vm0, 0.0, %v404_v37 }
  0xe4   :  { %v517_v44 = vsel %vm298_vm0, 0.0, %v516_v42  ;;  %vm687_vm0 = vcmask 257024  }
  0xe6   :  { %566 = vrot.lane.b32.xlu1 %v457_v16, %s792_s16  ;;  %550 = vrot.lane.b32.xlu2 %v453_v49, %s785_s12 }
  0xeb   :  { %572 = vrot.lane.b32.xlu0 %v353_v13, %s793_s17 }
  0xee   :  { %580 = vrot.lane.b32.xlu1 %v385_v22, %s794_s18  ;;  %564 = vrot.lane.b32.xlu2 %v345_v48, %s792_s16 }
  0xf3   :  { %582 = vrot.lane.b32.xlu0 %v497_v24, %s794_s18 }
  0xf6   :  { %574 = vrot.lane.b32.xlu2 %v465_v29, %s793_s17  ;;  %590 = vrot.lane.b32.xlu1 %v515_v30, %s795_s19 }
  0xfb   :  { %596 = vrot.lane.b32.xlu0 %v389_v31, %s796_s20 }
  0xfe   :  { %588 = vrot.lane.b32.xlu2 %v403_v40, %s795_s19  ;;  %604 = vrot.lane.b32.xlu1 %v405_v41, %s797_s21 }
 0x103   :  { %606 = vrot.lane.b32.xlu0 %v517_v44, %s797_s21 }
 0x106   :  { %598 = vrot.lane.b32.xlu2 %v501_v39, %s796_s20  ;;  %614 = vrot.lane.b32.xlu1 %v921_v56, %s798_s22 }
 0x10b   :  { %620 = vrot.lane.b32.xlu0 %v892_v21, %s799_s23 }
 0x10e   :  { %612 = vrot.lane.b32.xlu2 %v867_v59, %s798_s22  ;;  %628 = vrot.lane.b32.xlu1 %v861_v54, %s800_s24 }
 0x113   :  { %630 = vrot.lane.b32.xlu0 %v918_v53, %s800_s24 }
 0x116   :  { %622 = vrot.lane.b32.xlu2 %v938_v4, %s799_s23  ;;  %638 = vrot.lane.b32.xlu1 %v934_v2, %s801_s25 }
 0x11e   :  { %636 = vrot.lane.b32.xlu2 %v885_v10, %s801_s25 }
 0x125   :  { %v525_v32 = vpop.permute.xlu2 %524 }
 0x126   :  { %v643_v63 = vsel %vm642_vm1, %v851_v43, %v525_v32 }
 0x130   :  { %v535_v45 = vpop.permute.xlu2 %534 }
 0x138   :  { %v533_v46 = vpop.permute.xlu1 %532  ;;  %v543_v47 = vpop.permute.xlu2 %542 }
 0x139   :  { %v646_v0 = vsel %vm645_vm2, %v643_v63, %v533_v46 }
 0x140   :  { %v541_v49 = vpop.permute.xlu1 %540  ;;  %v551_v21 = vpop.permute.xlu2 %550 }
 0x141   :  { %v649_v2 = vsel %vm648_vm3, %v646_v0, %v541_v49 }
 0x148   :  { %v549_v50 = vpop.permute.xlu1 %548  ;;  %v565_v59 = vpop.permute.xlu2 %564 }
 0x149   :  { %v652_v4 = vsel %vm651_vm4, %v649_v2, %v549_v50 }
 0x14d   :  { %v527_v51 = vpop.permute.xlu0 %526 }
 0x14e   :  { %v644_v1 = vsel %vm642_vm1, %v906_v36, %v527_v51 }
 0x14f   :  { %v647_v34 = vsel %vm645_vm2, %v644_v1, %v535_v45 }
 0x150   :  { %v557_v52 = vpop.permute.xlu1 %556  ;;  %v575_v54 = vpop.permute.xlu2 %574  ;;  %v650_v8 = vsel %vm648_vm3, %v647_v34, %v543_v47 }
 0x151   :  { %v655_v7 = vsel %vm654_vm5, %v652_v4, %v557_v52  ;;  %v653_v11 = vsel %vm651_vm4, %v650_v8, %v551_v21 }
 0x152   :  { %v658_v9 = vsel %vm657_vm6, %v655_v7, %v565_v59 }
 0x155   :  { %v559_v55 = vpop.permute.xlu0 %558 }
 0x156   :  { %v656_v14 = vsel %vm654_vm5, %v653_v11, %v559_v55 }
 0x158   :  { %v567_v53 = vpop.permute.xlu1 %566  ;;  %v589_v56 = vpop.permute.xlu2 %588 }
 0x159   :  { %v659_v17 = vsel %vm657_vm6, %v656_v14, %v567_v53 }
 0x15a   :  { %v662_v20 = vsel %vm660_vm8, %v659_v17, %v575_v54 }
 0x15d   :  { %v573_v57 = vpop.permute.xlu0 %572 }
 0x15e   :  { %v661_v43 = vsel %vm660_vm8, %v658_v9, %v573_v57 }
 0x160   :  { %v581_v38 = vpop.permute.xlu1 %580  ;;  %v599_v58 = vpop.permute.xlu2 %598 }
 0x161   :  { %v664_v48 = vsel %vm663_vm7, %v661_v43, %v581_v38 }
 0x162   :  { %v667_v18 = vsel %vm666_vm9, %v664_v48, %v589_v56 }
 0x165   :  { %v583_v60 = vpop.permute.xlu0 %582 }
 0x166   :  { %v665_v13 = vsel %vm663_vm7, %v662_v20, %v583_v60 }
 0x168   :  { %v591_v61 = vpop.permute.xlu1 %590  ;;  %v613_v10 = vpop.permute.xlu2 %612 }
 0x169   :  { %v668_v23 = vsel %vm666_vm9, %v665_v13, %v591_v61 }
 0x16a   :  { %v671_v15 = vsel %vm669_vm11, %v668_v23, %v599_v58 }
 0x16d   :  { %v597_v62 = vpop.permute.xlu0 %596 }
 0x16e   :  { %v670_v5 = vsel %vm669_vm11, %v667_v18, %v597_v62 }
 0x170   :  { %v605_v3 = vpop.permute.xlu1 %604  ;;  %v623_v36 = vpop.permute.xlu2 %622 }
 0x171   :  { %v673_v19 = vsel %vm672_vm10, %v670_v5, %v605_v3 }
 0x172   :  { %v676_v22 = vsel %vm675_vm12, %v673_v19, %v613_v10 }
 0x175   :  { %v607_v6 = vpop.permute.xlu0 %606 }
 0x176   :  { %v674_v29 = vsel %vm672_vm10, %v671_v15, %v607_v6 }
 0x178   :  { %v615_v16 = vpop.permute.xlu1 %614  ;;  %v637_v26 = vpop.permute.xlu2 %636 }
 0x179   :  { %v677_v30 = vsel %vm675_vm12, %v674_v29, %v615_v16 }
 0x17a   :  { %v680_v33 = vsel %vm678_vm14, %v677_v30, %v623_v36 }
 0x17d   :  { %v621_v12 = vpop.permute.xlu0 %620 }
 0x17e   :  { %v679_v24 = vsel %vm678_vm14, %v676_v22, %v621_v12 }
 0x180   :  { %v629_v25 = vpop.permute.xlu1 %628 }
 0x181   :  { %v682_v27 = vsel %vm681_vm13, %v679_v24, %v629_v25 }
 0x182   :  { %v685_v28 = vsel %vm684_vm15, %v682_v27, %v637_v26 }
 0x183   :  { %688 = vst.msk [vmem:[#allocation5] sm:$0xf] %vm687_vm0, %v685_v28 }
 0x185   :  { %v631_v31 = vpop.permute.xlu0 %630 }
 0x186   :  { %v683_v35 = vsel %vm681_vm13, %v680_v33, %v631_v31 }
 0x188   :  { %v639_v37 = vpop.permute.xlu1 %638 }
 0x189   :  { %v686_v39 = vsel %vm684_vm15, %v683_v35, %v639_v37 }
 0x18a   :  { %689 = vst.msk [vmem:[#allocation5 + $0x4] sm:$0xf] %vm687_vm0, %v686_v39 }
 0x18b   :  { %702 = dma.vmem_to_hbm [thread:$0]  %s695_s30, 128, %s697_s28, [#allocation4], %s803_s2, %s803_s2, %s788_s0  }
 0x18c   :  { %781 = dma.done.wait [#allocation4], 128  }
 0x18d   :  { %782 = vsyncadd [#allocation4], 4294967168 }
 0x18e   :  { %707 = vsyncpa [#allocation3], 1 }
 0x18f   :  { %708 = vsyncpa [#allocation4], 1 }

</bundles_post_ra>
